<compile_context>
chip_gen: v7x
topology: tpu7x:2x2x1
jax: 0.10.0
libtpu: 0.0.40
codegen_flags: <defaults>
</compile_context>

<pallas_src>
import functools

import jax
import jax.numpy as jnp
from jax.experimental import pallas as pl
from jax.experimental.pallas import tpu as pltpu


def _label_smooth_kernel(pred_ref, tgt_ref, loss_ref,
                         m_ref, l_ref, sum_ref, tval_ref, acc_ref,
                         *, positive, negative, n_rows, n_cols,
                         tile_n, tile_c, mask_rows, mask_cols):
    i = pl.program_id(0)   # batch-tile index
    j = pl.program_id(1)   # class-tile index (reduction axis, innermost)
    ni = pl.num_programs(0)
    nj = pl.num_programs(1)

    # ---- init ----
    @pl.when(jnp.logical_and(i == 0, j == 0))
    def _():
        acc_ref[...] = jnp.zeros_like(acc_ref)

    @pl.when(j == 0)
    def _():
        m_ref[...] = jnp.full_like(m_ref, -jnp.inf)
        l_ref[...] = jnp.zeros_like(l_ref)
        sum_ref[...] = jnp.zeros_like(sum_ref)
        tval_ref[...] = jnp.zeros_like(tval_ref)

    # ---- streaming pass over this (TN, TC) logits block ----
    pred = pred_ref[...].astype(jnp.float32)                       # (TN, TC)
    tgt = tgt_ref[...]                                             # (TN, 1) int32

    col = jax.lax.broadcasted_iota(jnp.int32, pred.shape, 1) + j * tile_c

    if mask_cols:
        col_ok = col < n_cols
        pred_m = jnp.where(col_ok, pred, -jnp.inf)   # for max / exp
        pred_s = jnp.where(col_ok, pred, 0.0)        # for plain sums
    else:
        pred_m = pred
        pred_s = pred

    # Online logsumexp: running max + rescaled running sum-exp, (TN, 1) layout.
    m_old = m_ref[...]
    m_new = jnp.maximum(m_old, jnp.max(pred_m, axis=1, keepdims=True))
    l_ref[...] = (l_ref[...] * jnp.exp(m_old - m_new)
                  + jnp.sum(jnp.exp(pred_m - m_new), axis=1, keepdims=True))
    m_ref[...] = m_new

    # Running sum of logits and logit at the target class (target falls into
    # exactly one class tile, elsewhere the select contributes zero).
    sum_ref[...] += jnp.sum(pred_s, axis=1, keepdims=True)
    tval_ref[...] += jnp.sum(jnp.where(col == tgt, pred_s, 0.0),
                             axis=1, keepdims=True)

    # ---- finalize this batch tile (last class tile) ----
    @pl.when(j == nj - 1)
    def _():
        neg = jnp.float32(negative)
        pmn = jnp.float32(positive - negative)
        lse = m_ref[...] + jnp.log(l_ref[...])                     # (TN, 1)
        per_row = (-neg) * (sum_ref[...] - jnp.float32(n_cols) * lse) \
                  - pmn * (tval_ref[...] - lse)                    # (TN, 1)
        if mask_rows:
            row = jax.lax.broadcasted_iota(jnp.int32, per_row.shape, 0) + i * tile_n
            per_row = jnp.where(row < n_rows, per_row, 0.0)
        acc_ref[...] += jnp.sum(per_row, axis=0, keepdims=True)    # (1, 1)

    # ---- write the mean once, at the very last grid step ----
    @pl.when(jnp.logical_and(i == ni - 1, j == nj - 1))
    def _():
        loss_ref[...] = acc_ref[...] * jnp.float32(1.0 / n_rows)


def _choose_tiles(N, C, itemsize):
    # Class tile: full C unless vocab-scale; tiled TC must be a multiple of 128.
    if C <= 8192:
        tc = C
    else:
        tc = 2048
    # Row tile sized for ~2 MiB logits per block: keeps double-buffered inputs
    # well inside the scoped-VMEM limit on every generation (incl. v7x 64 MiB).
    target = 2 * 1024 * 1024
    tn = max(8, min(1024, (target // max(1, tc * itemsize)) // 8 * 8))
    if N <= tn:
        tn = N
    return tn, tc


def label_smooth_loss(pred, target, num_classes, smoothing=0.1, focal_factor=0.0,
                      *, tile_n=None, tile_c=None):
    """Pallas implementation of label_smooth_loss.forward.

    pred:   (N, C) float logits (f32 or bf16 — bf16 stays bf16 in HBM)
    target: (N,)   integer class ids
    returns scalar float32 loss
    """
    del focal_factor  # unused in the reference forward pass
    eps = smoothing / num_classes
    negative = float(eps)
    positive = float(1.0 - smoothing + eps)

    N, C = pred.shape
    itemsize = jnp.dtype(pred.dtype).itemsize
    auto_tn, auto_tc = _choose_tiles(N, C, itemsize)
    tn = min(int(tile_n), N) if tile_n is not None else auto_tn
    tc = min(int(tile_c), C) if tile_c is not None else auto_tc

    ni = pl.cdiv(N, tn)
    nj = pl.cdiv(C, tc)
    mask_rows = (N % tn) != 0
    mask_cols = (C % tc) != 0

    tgt2d = target.astype(jnp.int32).reshape(N, 1)

    kernel = functools.partial(
        _label_smooth_kernel,
        positive=positive, negative=negative,
        n_rows=N, n_cols=C, tile_n=tn, tile_c=tc,
        mask_rows=mask_rows, mask_cols=mask_cols)

    # VMEM budget: double-buffered inputs + lane-padded per-row scratch.
    vmem_bytes = (2 * tn * tc * itemsize      # logits blocks (double-buffered)
                  + 2 * tn * 128 * 4          # target blocks (lane-padded)
                  + 4 * tn * 128 * 4          # per-row f32 scratch (lane-padded)
                  + 4 * 8 * 128 * 4)          # scalar accumulator + output tiles
    vmem_limit = int(min(64 * 2**20, max(4 * 2**20, 2 * vmem_bytes)))

    cost = pl.CostEstimate(
        flops=5 * N * C,
        transcendentals=N * C,
        bytes_accessed=N * C * itemsize + N * 4 + 4)

    out = pl.pallas_call(
        kernel,
        out_shape=jax.ShapeDtypeStruct((1, 1), jnp.float32),
        grid_spec=pltpu.PrefetchScalarGridSpec(
            num_scalar_prefetch=0,
            grid=(ni, nj),
            in_specs=[
                pl.BlockSpec((tn, tc), lambda i, j: (i, j)),  # logits tile
                pl.BlockSpec((tn, 1), lambda i, j: (i, 0)),   # targets tile
            ],
            out_specs=pl.BlockSpec((1, 1), lambda i, j: (0, 0)),
            scratch_shapes=[
                pltpu.VMEM((tn, 1), jnp.float32),   # running row max
                pltpu.VMEM((tn, 1), jnp.float32),   # running row sum-exp
                pltpu.VMEM((tn, 1), jnp.float32),   # running sum of logits
                pltpu.VMEM((tn, 1), jnp.float32),   # logit at target class
                pltpu.VMEM((1, 1), jnp.float32),    # scalar loss accumulator
            ],
        ),
        compiler_params=pltpu.CompilerParams(
            dimension_semantics=("arbitrary", "arbitrary"),
            vmem_limit_bytes=vmem_limit),
        cost_estimate=cost,
    )(pred, tgt2d)
    return out[0, 0]


def _reference(pred, target, num_classes, smoothing=0.1):
    eps = smoothing / num_classes
    negative = eps
    positive = 1.0 - smoothing + eps
    logp = jax.nn.log_softmax(pred.astype(jnp.float32), axis=1)
    true_dist = jnp.full_like(logp, negative)
    true_dist = true_dist.at[jnp.arange(pred.shape[0]), target].set(positive)
    return jnp.mean(jnp.sum(-true_dist * logp, axis=1))


if __name__ == "__main__":
    key = jax.random.PRNGKey(0)
    k1, k2 = jax.random.split(key)

    # Case 1: tiny single-tile shape (batch=8, num_classes=16).
    N, C = 8, 16
    pred = jax.random.normal(k1, (N, C), dtype=jnp.float32)
    target = jax.random.randint(k2, (N,), 0, C, dtype=jnp.int32)
    loss = jax.block_until_ready(label_smooth_loss(pred, target, num_classes=C))
    ref = _reference(pred, target, num_classes=C)
    assert jnp.allclose(loss, ref, rtol=1e-5, atol=1e-5), (loss, ref)

    # Case 2: multi-tile grid over batch AND class axes with ragged (masked)
    # final tiles on both axes (exercises online-LSE + row/col masking).
    k3, k4 = jax.random.split(k1)
    N2, C2 = 20, 200
    pred2 = jax.random.normal(k3, (N2, C2), dtype=jnp.float32)
    target2 = jax.random.randint(k4, (N2,), 0, C2, dtype=jnp.int32)
    loss2 = jax.block_until_ready(
        label_smooth_loss(pred2, target2, num_classes=C2, tile_n=8, tile_c=128))
    ref2 = _reference(pred2, target2, num_classes=C2)
    assert jnp.allclose(loss2, ref2, rtol=1e-5, atol=1e-5), (loss2, ref2)

    # Case 3: bf16 logits stay bf16 in HBM; cast to f32 only inside the kernel.
    pred3 = pred2.astype(jnp.bfloat16)
    loss3 = jax.block_until_ready(
        label_smooth_loss(pred3, target2, num_classes=C2, tile_n=16, tile_c=C2))
    ref3 = _reference(pred3.astype(jnp.float32), target2, num_classes=C2)
    assert jnp.allclose(loss3, ref3, rtol=1e-4, atol=1e-4), (loss3, ref3)

    print("KERNEL_OK")
</pallas_src>

<mosaic_0001>
module attributes {stable_mosaic.version = 11 : i64} {
  func.func @_label_smooth_kernel(%arg0: i32, %arg1: i32, %arg2: memref<8x16xf32, #tpu.memory_space<vmem>>, %arg3: memref<8x1xi32, #tpu.memory_space<vmem>>, %arg4: memref<1x1xf32, #tpu.memory_space<vmem>>, %arg5: memref<8x1xf32, #tpu.memory_space<vmem>>, %arg6: memref<8x1xf32, #tpu.memory_space<vmem>>, %arg7: memref<8x1xf32, #tpu.memory_space<vmem>>, %arg8: memref<8x1xf32, #tpu.memory_space<vmem>>, %arg9: memref<1x1xf32, #tpu.memory_space<vmem>>) attributes {dimension_semantics = [#tpu.dimension_semantics<arbitrary>, #tpu.dimension_semantics<arbitrary>], iteration_bounds = array<i64: 1, 1>, scalar_prefetch = 0 : i64, scratch_operands = 5 : i64, tpu.core_type = #tpu.core_type<tc>, window_params = [{transform_indices = @transform_0, window_bounds = array<i64: 8, 16>}, {transform_indices = @transform_1, window_bounds = array<i64: 8, 1>}, {pipeline_mode = #tpu.pipeline_mode<synchronous>, transform_indices = @transform_2, window_bounds = array<i64: 1, 1>}]} {
    %c0_i32 = arith.constant 0 : i32
    %0 = arith.cmpi eq, %arg0, %c0_i32 : i32
    %c0_i32_0 = arith.constant 0 : i32
    %1 = arith.cmpi eq, %arg1, %c0_i32_0 : i32
    %2 = arith.andi %0, %1 : i1
    %3 = arith.extui %2 : i1 to i32
    %c0_i32_1 = arith.constant 0 : i32
    %4 = arith.cmpi ne, %3, %c0_i32_1 : i32
    scf.if %4 {
      %cst_32 = arith.constant 0.000000e+00 : f32
      %52 = vector.broadcast %cst_32 : f32 to vector<1x1xf32>
      %c0_33 = arith.constant 0 : index
      %c0_34 = arith.constant 0 : index
      %53 = vector.load %arg9[%c0_33, %c0_34] : memref<1x1xf32, #tpu.memory_space<vmem>>, vector<1x1xf32>
      tpu.vector_store %arg9[%c0_33, %c0_34], %52 {strides = array<i32>} : memref<1x1xf32, #tpu.memory_space<vmem>>, vector<1x1xf32>,
    } else {
    }
    %c0_i32_2 = arith.constant 0 : i32
    %5 = arith.cmpi eq, %arg1, %c0_i32_2 : i32
    %6 = arith.extui %5 : i1 to i32
    %c0_i32_3 = arith.constant 0 : i32
    %7 = arith.cmpi ne, %6, %c0_i32_3 : i32
    scf.if %7 {
      %cst_32 = arith.constant 0xFF800000 : f32
      %52 = vector.broadcast %cst_32 : f32 to vector<8x1xf32>
      %c0_33 = arith.constant 0 : index
      %c0_34 = arith.constant 0 : index
      %53 = vector.load %arg5[%c0_33, %c0_34] : memref<8x1xf32, #tpu.memory_space<vmem>>, vector<8x1xf32>
      tpu.vector_store %arg5[%c0_33, %c0_34], %52 {strides = array<i32>} : memref<8x1xf32, #tpu.memory_space<vmem>>, vector<8x1xf32>,
      %cst_35 = arith.constant 0.000000e+00 : f32
      %54 = vector.broadcast %cst_35 : f32 to vector<8x1xf32>
      %c0_36 = arith.constant 0 : index
      %c0_37 = arith.constant 0 : index
      %55 = vector.load %arg6[%c0_36, %c0_37] : memref<8x1xf32, #tpu.memory_space<vmem>>, vector<8x1xf32>
      tpu.vector_store %arg6[%c0_36, %c0_37], %54 {strides = array<i32>} : memref<8x1xf32, #tpu.memory_space<vmem>>, vector<8x1xf32>,
      %cst_38 = arith.constant 0.000000e+00 : f32
      %56 = vector.broadcast %cst_38 : f32 to vector<8x1xf32>
      %c0_39 = arith.constant 0 : index
      %c0_40 = arith.constant 0 : index
      %57 = vector.load %arg7[%c0_39, %c0_40] : memref<8x1xf32, #tpu.memory_space<vmem>>, vector<8x1xf32>
      tpu.vector_store %arg7[%c0_39, %c0_40], %56 {strides = array<i32>} : memref<8x1xf32, #tpu.memory_space<vmem>>, vector<8x1xf32>,
      %cst_41 = arith.constant 0.000000e+00 : f32
      %58 = vector.broadcast %cst_41 : f32 to vector<8x1xf32>
      %c0_42 = arith.constant 0 : index
      %c0_43 = arith.constant 0 : index
      %59 = vector.load %arg8[%c0_42, %c0_43] : memref<8x1xf32, #tpu.memory_space<vmem>>, vector<8x1xf32>
      tpu.vector_store %arg8[%c0_42, %c0_43], %58 {strides = array<i32>} : memref<8x1xf32, #tpu.memory_space<vmem>>, vector<8x1xf32>,
    } else {
    }
    %c0 = arith.constant 0 : index
    %c0_4 = arith.constant 0 : index
    %8 = vector.load %arg2[%c0, %c0_4] : memref<8x16xf32, #tpu.memory_space<vmem>>, vector<8x16xf32>
    %c0_5 = arith.constant 0 : index
    %c0_6 = arith.constant 0 : index
    %9 = vector.load %arg3[%c0_5, %c0_6] : memref<8x1xi32, #tpu.memory_space<vmem>>, vector<8x1xi32>
    %10 = tpu.iota {dimensions = array<i32: 1>} : vector<8x16xi32>
    %c16_i32 = arith.constant 16 : i32
    %11 = arith.muli %arg1, %c16_i32 : i32
    %12 = vector.broadcast %11 : i32 to vector<8x16xi32>
    %13 = arith.addi %10, %12 : vector<8x16xi32>
    %c0_7 = arith.constant 0 : index
    %c0_8 = arith.constant 0 : index
    %14 = vector.load %arg5[%c0_7, %c0_8] : memref<8x1xf32, #tpu.memory_space<vmem>>, vector<8x1xf32>
    %cst = arith.constant dense<0xFF800000> : vector<8xf32>
    %15 = vector.multi_reduction <maximumf>, %8, %cst [1] : vector<8x16xf32> to vector<8xf32>
    %16 = vector.shape_cast %15 : vector<8xf32> to vector<8x1xf32>
    %17 = arith.maximumf %14, %16 : vector<8x1xf32>
    %c0_9 = arith.constant 0 : index
    %c0_10 = arith.constant 0 : index
    %18 = vector.load %arg6[%c0_9, %c0_10] : memref<8x1xf32, #tpu.memory_space<vmem>>, vector<8x1xf32>
    %19 = arith.subf %14, %17 : vector<8x1xf32>
    %20 = math.exp %19 : vector<8x1xf32>
    %21 = arith.mulf %18, %20 : vector<8x1xf32>
    %22 = vector.broadcast %17 : vector<8x1xf32> to vector<8x16xf32>
    %23 = arith.subf %8, %22 : vector<8x16xf32>
    %24 = math.exp %23 : vector<8x16xf32>
    %cst_11 = arith.constant dense<0.000000e+00> : vector<8xf32>
    %25 = vector.multi_reduction <add>, %24, %cst_11 [1] : vector<8x16xf32> to vector<8xf32>
    %26 = vector.shape_cast %25 : vector<8xf32> to vector<8x1xf32>
    %27 = arith.addf %21, %26 : vector<8x1xf32>
    %c0_12 = arith.constant 0 : index
    %c0_13 = arith.constant 0 : index
    %28 = vector.load %arg6[%c0_12, %c0_13] : memref<8x1xf32, #tpu.memory_space<vmem>>, vector<8x1xf32>
    tpu.vector_store %arg6[%c0_12, %c0_13], %27 {strides = array<i32>} : memref<8x1xf32, #tpu.memory_space<vmem>>, vector<8x1xf32>,
    %c0_14 = arith.constant 0 : index
    %c0_15 = arith.constant 0 : index
    %29 = vector.load %arg5[%c0_14, %c0_15] : memref<8x1xf32, #tpu.memory_space<vmem>>, vector<8x1xf32>
    tpu.vector_store %arg5[%c0_14, %c0_15], %17 {strides = array<i32>} : memref<8x1xf32, #tpu.memory_space<vmem>>, vector<8x1xf32>,
    %c0_16 = arith.constant 0 : index
    %c0_17 = arith.constant 0 : index
    %30 = vector.load %arg7[%c0_16, %c0_17] : memref<8x1xf32, #tpu.memory_space<vmem>>, vector<8x1xf32>
    %cst_18 = arith.constant dense<0.000000e+00> : vector<8xf32>
    %31 = vector.multi_reduction <add>, %8, %cst_18 [1] : vector<8x16xf32> to vector<8xf32>
    %32 = vector.shape_cast %31 : vector<8xf32> to vector<8x1xf32>
    %33 = arith.addf %30, %32 : vector<8x1xf32>
    %c0_19 = arith.constant 0 : index
    %c0_20 = arith.constant 0 : index
    %34 = vector.load %arg7[%c0_19, %c0_20] : memref<8x1xf32, #tpu.memory_space<vmem>>, vector<8x1xf32>
    tpu.vector_store %arg7[%c0_19, %c0_20], %33 {strides = array<i32>} : memref<8x1xf32, #tpu.memory_space<vmem>>, vector<8x1xf32>,
    %c0_21 = arith.constant 0 : index
    %c0_22 = arith.constant 0 : index
    %35 = vector.load %arg8[%c0_21, %c0_22] : memref<8x1xf32, #tpu.memory_space<vmem>>, vector<8x1xf32>
    %36 = vector.broadcast %9 : vector<8x1xi32> to vector<8x16xi32>
    %37 = arith.cmpi eq, %13, %36 : vector<8x16xi32>
    %cst_23 = arith.constant 0.000000e+00 : f32
    %38 = vector.broadcast %cst_23 : f32 to vector<8x16xf32>
    %39 = arith.select %37, %8, %38 : vector<8x16xi1>, vector<8x16xf32>
    %cst_24 = arith.constant dense<0.000000e+00> : vector<8xf32>
    %40 = vector.multi_reduction <add>, %39, %cst_24 [1] : vector<8x16xf32> to vector<8xf32>
    %41 = vector.shape_cast %40 : vector<8xf32> to vector<8x1xf32>
    %42 = arith.addf %35, %41 : vector<8x1xf32>
    %c0_25 = arith.constant 0 : index
    %c0_26 = arith.constant 0 : index
    %43 = vector.load %arg8[%c0_25, %c0_26] : memref<8x1xf32, #tpu.memory_space<vmem>>, vector<8x1xf32>
    tpu.vector_store %arg8[%c0_25, %c0_26], %42 {strides = array<i32>} : memref<8x1xf32, #tpu.memory_space<vmem>>, vector<8x1xf32>,
    %c0_i32_27 = arith.constant 0 : i32
    %44 = arith.cmpi eq, %arg1, %c0_i32_27 : i32
    %45 = arith.extui %44 : i1 to i32
    %c0_i32_28 = arith.constant 0 : i32
    %46 = arith.cmpi ne, %45, %c0_i32_28 : i32
    scf.if %46 {
      %c0_32 = arith.constant 0 : index
      %c0_33 = arith.constant 0 : index
      %52 = vector.load %arg5[%c0_32, %c0_33] : memref<8x1xf32, #tpu.memory_space<vmem>>, vector<8x1xf32>
      %c0_34 = arith.constant 0 : index
      %c0_35 = arith.constant 0 : index
      %53 = vector.load %arg6[%c0_34, %c0_35] : memref<8x1xf32, #tpu.memory_space<vmem>>, vector<8x1xf32>
      %54 = math.log %53 : vector<8x1xf32>
      %55 = arith.addf %52, %54 : vector<8x1xf32>
      %cst_36 = arith.constant 0.000000e+00 : f32
      %cst_37 = arith.constant 6.250000e-03 : f32
      %56 = arith.subf %cst_36, %cst_37 : f32
      %c0_38 = arith.constant 0 : index
      %c0_39 = arith.constant 0 : index
      %57 = vector.load %arg7[%c0_38, %c0_39] : memref<8x1xf32, #tpu.memory_space<vmem>>, vector<8x1xf32>
      %cst_40 = arith.constant 1.600000e+01 : f32
      %58 = vector.broadcast %cst_40 : f32 to vector<8x1xf32>
      %59 = arith.mulf %58, %55 : vector<8x1xf32>
      %60 = arith.subf %57, %59 : vector<8x1xf32>
      %61 = vector.broadcast %56 : f32 to vector<8x1xf32>
      %62 = arith.mulf %61, %60 : vector<8x1xf32>
      %c0_41 = arith.constant 0 : index
      %c0_42 = arith.constant 0 : index
      %63 = vector.load %arg8[%c0_41, %c0_42] : memref<8x1xf32, #tpu.memory_space<vmem>>, vector<8x1xf32>
      %64 = arith.subf %63, %55 : vector<8x1xf32>
      %cst_43 = arith.constant 0.899999976 : f32
      %65 = vector.broadcast %cst_43 : f32 to vector<8x1xf32>
      %66 = arith.mulf %65, %64 : vector<8x1xf32>
      %67 = arith.subf %62, %66 : vector<8x1xf32>
      %c0_44 = arith.constant 0 : index
      %c0_45 = arith.constant 0 : index
      %68 = vector.load %arg9[%c0_44, %c0_45] : memref<1x1xf32, #tpu.memory_space<vmem>>, vector<1x1xf32>
      %cst_46 = arith.constant dense<0.000000e+00> : vector<1xf32>
      %69 = vector.multi_reduction <add>, %67, %cst_46 [0] : vector<8x1xf32> to vector<1xf32>
      %70 = vector.shape_cast %69 : vector<1xf32> to vector<1x1xf32>
      %71 = arith.addf %68, %70 : vector<1x1xf32>
      %c0_47 = arith.constant 0 : index
      %c0_48 = arith.constant 0 : index
      %72 = vector.load %arg9[%c0_47, %c0_48] : memref<1x1xf32, #tpu.memory_space<vmem>>, vector<1x1xf32>
      tpu.vector_store %arg9[%c0_47, %c0_48], %71 {strides = array<i32>} : memref<1x1xf32, #tpu.memory_space<vmem>>, vector<1x1xf32>,
    } else {
    }
    %c0_i32_29 = arith.constant 0 : i32
    %47 = arith.cmpi eq, %arg0, %c0_i32_29 : i32
    %c0_i32_30 = arith.constant 0 : i32
    %48 = arith.cmpi eq, %arg1, %c0_i32_30 : i32
    %49 = arith.andi %47, %48 : i1
    %50 = arith.extui %49 : i1 to i32
    %c0_i32_31 = arith.constant 0 : i32
    %51 = arith.cmpi ne, %50, %c0_i32_31 : i32
    scf.if %51 {
      %c0_32 = arith.constant 0 : index
      %c0_33 = arith.constant 0 : index
      %52 = vector.load %arg9[%c0_32, %c0_33] : memref<1x1xf32, #tpu.memory_space<vmem>>, vector<1x1xf32>
      %cst_34 = arith.constant 1.250000e-01 : f32
      %53 = vector.broadcast %cst_34 : f32 to vector<1x1xf32>
      %54 = arith.mulf %52, %53 : vector<1x1xf32>
      %c0_35 = arith.constant 0 : index
      %c0_36 = arith.constant 0 : index
      %55 = vector.load %arg4[%c0_35, %c0_36] : memref<1x1xf32, #tpu.memory_space<vmem>>, vector<1x1xf32>
      tpu.vector_store %arg4[%c0_35, %c0_36], %54 {strides = array<i32>} : memref<1x1xf32, #tpu.memory_space<vmem>>, vector<1x1xf32>,
    } else {
    }
    return
  }
  func.func @transform_0(%arg0: i32, %arg1: i32) -> (i32, i32) {
    %c0_i32 = arith.constant 0 : i32
    return %arg0, %arg1 : i32, i32
  }
  func.func @transform_1(%arg0: i32, %arg1: i32) -> (i32, i32) {
    %c0_i32 = arith.constant 0 : i32
    %c0_i32_0 = arith.constant 0 : i32
    return %arg0, %c0_i32 : i32, i32
  }
  func.func @transform_2(%arg0: i32, %arg1: i32) -> (i32, i32) {
    %c0_i32 = arith.constant 0 : i32
    %c0_i32_0 = arith.constant 0 : i32
    %c0_i32_1 = arith.constant 0 : i32
    return %c0_i32, %c0_i32_0 : i32, i32
  }
}

</mosaic_0001>

<bundles_post_ra>
// kernel: tpu_custom_call.1
= control target key start
LH: loop header
LB: loop body
LE: loop exit
PB: predicated region body
PF: predicated region fallthrough
CT: control target
= control target key end

     0   :  { %vm36_vm0 = vcmask 130048   ;;  %s214_s0 = inlined_call_operand.vmem [shape: f32[8,16], index: 0, kind: input, shape index: {}]   ;;  %s215_s1 = inlined_call_operand.vmem [shape: s32[8,1], index: 1, kind: input, shape index: {}]   ;;  %s216_s2 = inlined_call_operand.hbm [shape: f32[1,1], index: 2, kind: output, shape index: {}]  }
   0x1   :  { %v28_v0 = vld [vmem:[%s214_s0] sm:$0xff] }
   0x2   :  { %7 = vsyncpa [#allocation8], 0  ;;  %v37_v1 = vsel %vm36_vm0, %v28_v0, -inf  ;;  %vm23_vm1 = vcmask 7168   ;;  %v161_v2 = vmov -inf   ;;  %v162_v3 = vmov 0  }
   0x3   :  { %38 = vmax.xlane.f32.xlu0 %v37_v1  ;;  %24 = vst.msk [vmem:[#allocation2] sm:$0xff] %vm23_vm1, %v161_v2  ;;  %130 = vset.pattern.permute.xlu1 %v162_v3  ;;  %v29_v4 = vld [vmem:[%s215_s1] sm:$0xff]  ;;  %v163_v5 = vmov 0.0   ;;  %v30_v13 = vlaneseq  ;;  %v62_v18 = vsel %vm36_vm0, %v28_v0, 0.0  ;;  %vm18_vm3 = vcmask 0   ;;  %s164_s0 = smov [#allocation7]  }
   0x4   :  { %129 = vset.pattern.permute.xlu0 %v162_v3  ;;  %69 = vperm.xlu1 %130, %v29_v4   ;;  %25 = vst.msk [vmem:[#allocation3] sm:$0xff] %vm23_vm1, %v163_v5  ;;  %26 = vst.msk [vmem:[#allocation4] sm:$0xff] %vm23_vm1, %v163_v5  ;;  %s117_s1 = sshll.u32 %s164_s0, 4  ;;  %s118_s1 = int_to_ptr.vmem [resolvable:$true] %s117_s1 }
   0x5   :  { %27 = vst.msk [vmem:[#allocation5] sm:$0xff] %vm23_vm1, %v163_v5  ;;  %v31_v14 = vand.u32 127, %v30_v13  ;;  %s137_s13 = scalar_lea.vmem %s118_s1, 16  ;;  %s141_s14 = scalar_lea.vmem %s118_s1, 32 }
   0x6   :  { %19 = vst.msk [vmem:[#allocation6] sm:$0x1] %vm18_vm3, %v163_v5  ;;  %p138_p0 = scmp.ne.s32.totalorder %s118_s1, %s137_s13  ;;  %p142_p1 = scmp.lt.s32.totalorder %s118_s1, %s118_s1 }
   0x7   :  { %p143_p2 = scmp.lt.s32.totalorder %s141_s14, %s137_s13 }
   0x9   :  { %p144_p3 = por %p143_p2, %p142_p1 }
   0xa   :  { %v35_v6 = vld [vmem:[#allocation2] sm:$0xff] }
   0xb   :  { %v41_v23 = vld [vmem:[#allocation3] sm:$0xff]  ;;  %v61_v27 = vld [vmem:[#allocation4] sm:$0xff]  ;;  %p145_p4 = pnand %p144_p3, %p138_p0 }
   0xc   :  { %v67_v30 = vld [vmem:[#allocation5] sm:$0xff] }
   0xd   :  { %v94_v52 = vld [vmem:[#allocation6] sm:$0x1] }
  0x83   :  { %v70_v15 = vpop.permute.xlu1 %69 }
  0x84   :  { %vm71_vm2 = vcmp.eq.s32.totalorder %v31_v14, %v70_v15 }
  0x85   :  { %v72_v19 = vsel %vm71_vm2, %v28_v0, 0.0 }
  0x86   :  { %v73_v20 = vsel %vm36_vm0, %v72_v19, 0.0 }
  0x90   :  { %v39_v7 = vpop.xlane.xlu0 %38 }
  0x91   :  { %v40_v8 = vmax.f32 %v35_v6, %v39_v7 }
  0x93   :  { %v42_v9 = vsub.f32 %v35_v6, %v40_v8  ;;  %60 = vst.msk [vmem:[#allocation2] sm:$0xff] %vm23_vm1, %v40_v8  ;;  %48 = vperm.xlu0 %129, %v40_v8  }
  0x95   :  { %v43_v21 = vmul.f32 1.442695, %v42_v9 }
  0x9a   :  { %v81_v36 = vld [vmem:[#allocation2] sm:$0xff] }
 0x112   :  { %v49_v10 = vpop.permute.xlu0 %48 }
 0x113   :  { %v51_v11 = vsub.f32 %v28_v0, %v49_v10 }
 0x115   :  { %v52_v12 = vmul.f32 1.442695, %v51_v11 }
 0x117   :  { %131 = vpow2.f32 %v52_v12 }
 0x118   :  { %133 = vpow2.f32 %v43_v21 }
 0x121   :  { %v132_v16 = vpop.eup %131 }
 0x122   :  { %v54_v17 = vsel %vm36_vm0, %v132_v16, 0.0  ;;  %v134_v22 = vpop.eup %133 }
 0x123   :  { %55 = vadd.xlane.f32.xlu1 %v54_v17  ;;  %v45_v24 = vmul.f32 %v134_v22, %v41_v23 }
 0x127   :  { %63 = vadd.xlane.f32.xlu1 %v62_v18 }
 0x12b   :  { %74 = vadd.xlane.f32.xlu1 %v73_v20 }
 0x1b0   :  { %v56_v25 = vpop.xlane.xlu1 %55 }
 0x1b1   :  { %v57_v26 = vadd.f32 %v56_v25, %v45_v24 }
 0x1b3   :  { %59 = vst.msk [vmem:[#allocation3] sm:$0xff] %vm23_vm1, %v57_v26 }
 0x1b4   :  { %v64_v28 = vpop.xlane.xlu1 %63 }
 0x1b5   :  { %v65_v29 = vadd.f32 %v64_v28, %v61_v27 }
 0x1b7   :  { %66 = vst.msk [vmem:[#allocation4] sm:$0xff] %vm23_vm1, %v65_v29 }
 0x1b8   :  { %v75_v31 = vpop.xlane.xlu1 %74 }
 0x1b9   :  { %v76_v32 = vadd.f32 %v75_v31, %v67_v30 }
 0x1ba   :  { %v82_v33 = vld [vmem:[#allocation3] sm:$0xff] }
 0x1bb   :  { %77 = vst.msk [vmem:[#allocation5] sm:$0xff] %vm23_vm1, %v76_v32  ;;  %135 = vlog2.f32 %v82_v33 }
 0x1be   :  { %v86_v41 = vld [vmem:[#allocation4] sm:$0xff] }
 0x1c2   :  { %v90_v37 = vld [vmem:[#allocation5] sm:$0xff] }
 0x1c5   :  { %v136_v34 = vpop.eup %135 }
 0x1c6   :  { %v84_v35 = vmul.f32 0.6931472, %v136_v34 }
 0x1c8   :  { %v85_v38 = vadd.f32 %v84_v35, %v81_v36 }
 0x1ca   :  { %v87_v39 = vmul.f32 16.0, %v85_v38  ;;  %v91_v40 = vsub.f32 %v90_v37, %v85_v38 }
 0x1cc   :  { %v88_v42 = vsub.f32 %v86_v41, %v87_v39  ;;  %v92_v44 = vmul.f32 0.9, %v91_v40 }
 0x1ce   :  { %v89_v43 = vmul.f32 -0.00625, %v88_v42 }
 0x1d0   :  { %v93_v45 = vsub.f32 %v89_v43, %v92_v44 }
 0x1d2   :  { %v95_v46 = vsel %vm23_vm1, %v93_v45, 0.0 }
 0x1d3   :  { %v96_v47 = vrot.slane %v95_v46, 4 }
 0x1d5   :  { %v97_v48 = vadd.f32 %v96_v47, %v95_v46 }
 0x1d7   :  { %v98_v49 = vrot.slane %v97_v48, 2 }
 0x1d9   :  { %v99_v50 = vadd.f32 %v98_v49, %v97_v48 }
 0x1db   :  { %v100_v51 = vrot.slane %v99_v50, 1 }
 0x1dd   :  { %v101_v53 = vadd.f32 %v100_v51, %v99_v50 }
 0x1df   :  { %v102_v54 = vadd.f32 %v101_v53, %v94_v52 }
 0x1e1   :  { %104 = vst.msk [vmem:[#allocation6] sm:$0x1] %vm18_vm3, %v102_v54 }
 0x1e8   :  { %v107_v55 = vld [vmem:[#allocation6] sm:$0x1] }
 0x1e9   :  { %v108_v56 = vmul.f32 0.125, %v107_v55 }
 0x1eb   :  { %110 = vst.msk [vmem:[#allocation7] sm:$0x1] %vm18_vm3, %v108_v56 }
 0x1ec   :  { %148 = shalt.err (!%p145_p4)
}
 0x1ed   :  { %s149_s17 = scalar_lea.hbm %s216_s2, 16 }
 0x1ee   :  { %p150_p5 = scmp.ne.s32.totalorder %s216_s2, %s149_s17  ;;  %p153_p6 = scmp.lt.u32.totalorder %s149_s17, %s216_s2 }
 0x1f0   :  { %p155_p7 = pnand %p153_p6, %p150_p5 }
 0x1f2   :  { %158 = shalt.err (!%p155_p7)
}
 0x1f3   :  { %120 = dma.vmem_to_hbm [thread:$0]  %s118_s1, 16, %s216_s2, [#allocation8]  }
 0x1f4   :  { %159 = dma.done.wait [#allocation8], 16  }
 0x1f5   :  { %160 = vsyncadd [#allocation8], 4294967280 }
 0x1f6   :  { %124 = vsyncpa [#allocation8], 1 }

</bundles_post_ra>
